<compile_context>
chip_gen: v5e
topology: v5e:2x2
jax: 0.10.0
libtpu: 0.0.40
codegen_flags: <defaults>
</compile_context>

<pallas_src>
import math

import jax
import jax.numpy as jnp
from jax.experimental import pallas as pl
from jax.experimental.pallas import tpu as pltpu


def _round_up(x, m):
    return ((x + m - 1) // m) * m


def _sublane(dtype):
    # Sublane packing of the second-minor dim: 8 for 4-byte, 16 for 2-byte, 32 for 1-byte.
    return {4: 8, 2: 16, 1: 32}.get(jnp.dtype(dtype).itemsize, 8)


def _metanet_kernel(x_ref, w1_ref, b1_ref, w2_ref, b2_ref, o_ref):
    # h = relu(x @ w1 + b1), accumulated in f32 on the MXU.
    h = jnp.dot(x_ref[...], w1_ref[...], preferred_element_type=jnp.float32)
    h = jnp.maximum(h + b1_ref[...].astype(jnp.float32), 0.0)
    # out = h @ w2 + b2 (f32 accumulation; cast of h is a no-op for f32 weights).
    out = jnp.dot(h.astype(w2_ref.dtype), w2_ref[...],
                  preferred_element_type=jnp.float32)
    o_ref[...] = (out + b2_ref[...].astype(jnp.float32)).astype(o_ref.dtype)


def _choose_row_tile(bs, block_rows, row_tile):
    """Row tile: multiple of row_tile, <= block_rows; >=2 (even-count) blocks if possible."""
    tm = min(_round_up(max(block_rows, row_tile), row_tile),
             _round_up(bs, row_tile))
    if bs >= 2 * row_tile:
        n = max(2, -(-bs // tm))
        if n % 2:
            n += 1                       # even block count -> balanced v7x megacore split
        tm = max(row_tile, min(tm, _round_up(-(-bs // n), row_tile)))
    return tm


def metanet_flat(x, w1, b1, w2, b2, *, block_rows=1024, out_dtype=None):
    """MetaNetFlat.forward: relu(x @ w1 + b1) @ w2 + b2, reshaped to (-1, emb_dim).

    x  : (bs, emb_dim)
    w1 : (emb_dim, meta_dim)   (PyTorch Linear weight pre-transposed)
    b1 : (1, meta_dim)
    w2 : (meta_dim, emb_dim)
    b2 : (1, emb_dim)
    """
    bs, emb_dim = x.shape
    meta_dim = w1.shape[1]
    out_dtype = x.dtype if out_dtype is None else jnp.dtype(out_dtype)

    row_tile = max(_sublane(x.dtype), _sublane(out_dtype))
    tm = _choose_row_tile(bs, block_rows, row_tile)
    n_blocks = pl.cdiv(bs, tm)

    # Rough VMEM budget: double-buffered x/out tiles + (double-buffered) resident
    # weights/biases + f32 intermediates, with 2x slack; capped at 75% of physical VMEM.
    xbytes = jnp.dtype(x.dtype).itemsize
    wbytes = jnp.dtype(w1.dtype).itemsize
    obytes = jnp.dtype(out_dtype).itemsize
    est = (2 * tm * emb_dim * xbytes                                  # x (double-buffered)
           + 2 * tm * emb_dim * obytes                                # out (double-buffered)
           + 2 * (emb_dim * meta_dim + meta_dim * emb_dim) * wbytes   # weights
           + 2 * (meta_dim + emb_dim) * wbytes                        # biases
           + tm * (meta_dim + emb_dim) * 4)                           # f32 intermediates
    try:
        phys_vmem = int(pltpu.get_tpu_info().vmem_capacity_bytes)
    except Exception:
        phys_vmem = 64 << 20             # v7x per-core VMEM (smallest across generations)
    vmem_limit = int(min(max(2 * est, 8 << 20), (3 * phys_vmem) // 4))

    out = pl.pallas_call(
        _metanet_kernel,
        out_shape=jax.ShapeDtypeStruct((bs, emb_dim), out_dtype),
        grid_spec=pl.GridSpec(
            grid=(n_blocks,),
            in_specs=[
                pl.BlockSpec((tm, emb_dim), lambda i: (i, 0)),
                # Weights/biases: constant index_map -> resident across grid steps.
                pl.BlockSpec((emb_dim, meta_dim), lambda i: (0, 0)),
                pl.BlockSpec((1, meta_dim), lambda i: (0, 0)),
                pl.BlockSpec((meta_dim, emb_dim), lambda i: (0, 0)),
                pl.BlockSpec((1, emb_dim), lambda i: (0, 0)),
            ],
            out_specs=pl.BlockSpec((tm, emb_dim), lambda i: (i, 0)),
        ),
        compiler_params=pltpu.CompilerParams(
            dimension_semantics=("parallel",),
            vmem_limit_bytes=vmem_limit,
        ),
    )(x, w1, b1, w2, b2)

    # forward() returns output.reshape(-1, emb_dim); already (bs, emb_dim) here.
    return out.reshape(-1, emb_dim)


def init_params(key, emb_dim, meta_dim):
    """Deterministic PyTorch-Linear-style init (uniform +- 1/sqrt(fan_in))."""
    k1, k2, k3, k4 = jax.random.split(key, 4)
    lim1 = 1.0 / math.sqrt(emb_dim)
    lim2 = 1.0 / math.sqrt(meta_dim)
    # weights stored pre-transposed to (in_features, out_features)
    w1 = jax.random.uniform(k1, (emb_dim, meta_dim), jnp.float32, -lim1, lim1)
    b1 = jax.random.uniform(k2, (1, meta_dim), jnp.float32, -lim1, lim1)
    w2 = jax.random.uniform(k3, (meta_dim, emb_dim), jnp.float32, -lim2, lim2)
    b2 = jax.random.uniform(k4, (1, emb_dim), jnp.float32, -lim2, lim2)
    return w1, b1, w2, b2


def _ref(x, w1, b1, w2, b2):
    return (jnp.maximum(x @ w1 + b1, 0.0) @ w2 + b2).reshape(-1, w2.shape[1])


if __name__ == "__main__":
    emb_dim, meta_dim = 32, 64
    key = jax.random.PRNGKey(0)
    kx, kp, kx2 = jax.random.split(key, 3)
    w1, b1, w2, b2 = init_params(kp, emb_dim, meta_dim)

    # 1) Tiny batch (single block), f32.
    bs = 8
    x = jax.random.normal(kx, (bs, emb_dim), jnp.float32)
    out = jax.block_until_ready(metanet_flat(x, w1, b1, w2, b2))
    ref = _ref(x, w1, b1, w2, b2)
    assert out.shape == (bs, emb_dim)
    assert jnp.allclose(out, ref, atol=1e-5, rtol=1e-5)

    # 2) Larger, non-tile-aligned batch: multi-block grid + ragged last block, f32.
    bs2 = 300
    x2 = jax.random.normal(kx2, (bs2, emb_dim), jnp.float32)
    out2 = jax.block_until_ready(metanet_flat(x2, w1, b1, w2, b2, block_rows=128))
    ref2 = _ref(x2, w1, b1, w2, b2)
    assert out2.shape == (bs2, emb_dim)
    assert jnp.allclose(out2, ref2, atol=1e-5, rtol=1e-5)

    # 3) Default (large) row tile + bf16 output (halves writeback bytes), f32 compute.
    out3 = jax.block_until_ready(
        metanet_flat(x2, w1, b1, w2, b2, out_dtype=jnp.bfloat16))
    assert out3.shape == (bs2, emb_dim)
    assert out3.dtype == jnp.bfloat16
    assert jnp.allclose(out3.astype(jnp.float32), ref2, atol=5e-2, rtol=5e-2)

    print("KERNEL_OK")
</pallas_src>

<mosaic_0001>
module attributes {stable_mosaic.version = 11 : i64} {
  func.func @_metanet_kernel(%arg0: i32, %arg1: memref<8x32xf32, #tpu.memory_space<vmem>>, %arg2: memref<32x64xf32, #tpu.memory_space<vmem>>, %arg3: memref<1x64xf32, #tpu.memory_space<vmem>>, %arg4: memref<64x32xf32, #tpu.memory_space<vmem>>, %arg5: memref<1x32xf32, #tpu.memory_space<vmem>>, %arg6: memref<8x32xf32, #tpu.memory_space<vmem>>) attributes {dimension_semantics = [#tpu.dimension_semantics<parallel>], iteration_bounds = array<i64: 1>, scalar_prefetch = 0 : i64, scratch_operands = 0 : i64, tpu.core_type = #tpu.core_type<tc>, window_params = [{transform_indices = @transform_0, window_bounds = array<i64: 8, 32>}, {pipeline_mode = #tpu.pipeline_mode<synchronous>, transform_indices = @transform_1, window_bounds = array<i64: 32, 64>}, {pipeline_mode = #tpu.pipeline_mode<synchronous>, transform_indices = @transform_2, window_bounds = array<i64: 1, 64>}, {pipeline_mode = #tpu.pipeline_mode<synchronous>, transform_indices = @transform_3, window_bounds = array<i64: 64, 32>}, {pipeline_mode = #tpu.pipeline_mode<synchronous>, transform_indices = @transform_4, window_bounds = array<i64: 1, 32>}, {transform_indices = @transform_5, window_bounds = array<i64: 8, 32>}]} {
    %c0 = arith.constant 0 : index
    %c0_0 = arith.constant 0 : index
    %0 = vector.load %arg1[%c0, %c0_0] : memref<8x32xf32, #tpu.memory_space<vmem>>, vector<8x32xf32>
    %c0_1 = arith.constant 0 : index
    %c0_2 = arith.constant 0 : index
    %1 = vector.load %arg2[%c0_1, %c0_2] : memref<32x64xf32, #tpu.memory_space<vmem>>, vector<32x64xf32>
    %cst = arith.constant dense<0.000000e+00> : vector<8x64xf32>
    %2 = tpu.matmul %0, %1, %cst {dimension_numbers = #tpu.dot_dimension_numbers<[1], [0], [0], [1], [0, 0, 1, 1], [], []>} : vector<8x32xf32>, vector<32x64xf32>, vector<8x64xf32> -> vector<8x64xf32>
    %c0_3 = arith.constant 0 : index
    %c0_4 = arith.constant 0 : index
    %3 = vector.load %arg3[%c0_3, %c0_4] : memref<1x64xf32, #tpu.memory_space<vmem>>, vector<1x64xf32>
    %4 = vector.broadcast %3 : vector<1x64xf32> to vector<8x64xf32>
    %5 = arith.addf %2, %4 : vector<8x64xf32>
    %cst_5 = arith.constant 0.000000e+00 : f32
    %6 = vector.broadcast %cst_5 : f32 to vector<8x64xf32>
    %7 = arith.maximumf %5, %6 : vector<8x64xf32>
    %c0_6 = arith.constant 0 : index
    %c0_7 = arith.constant 0 : index
    %8 = vector.load %arg4[%c0_6, %c0_7] : memref<64x32xf32, #tpu.memory_space<vmem>>, vector<64x32xf32>
    %cst_8 = arith.constant dense<0.000000e+00> : vector<8x32xf32>
    %9 = tpu.matmul %7, %8, %cst_8 {dimension_numbers = #tpu.dot_dimension_numbers<[1], [0], [0], [1], [0, 0, 1, 1], [], []>} : vector<8x64xf32>, vector<64x32xf32>, vector<8x32xf32> -> vector<8x32xf32>
    %c0_9 = arith.constant 0 : index
    %c0_10 = arith.constant 0 : index
    %10 = vector.load %arg5[%c0_9, %c0_10] : memref<1x32xf32, #tpu.memory_space<vmem>>, vector<1x32xf32>
    %11 = vector.broadcast %10 : vector<1x32xf32> to vector<8x32xf32>
    %12 = arith.addf %9, %11 : vector<8x32xf32>
    %c0_11 = arith.constant 0 : index
    %c0_12 = arith.constant 0 : index
    %13 = vector.load %arg6[%c0_11, %c0_12] : memref<8x32xf32, #tpu.memory_space<vmem>>, vector<8x32xf32>
    tpu.vector_store %arg6[%c0_11, %c0_12], %12 {strides = array<i32>} : memref<8x32xf32, #tpu.memory_space<vmem>>, vector<8x32xf32>,
    return
  }
  func.func @transform_0(%arg0: i32) -> (i32, i32) {
    %c0_i32 = arith.constant 0 : i32
    %c0_i32_0 = arith.constant 0 : i32
    return %arg0, %c0_i32 : i32, i32
  }
  func.func @transform_1(%arg0: i32) -> (i32, i32) {
    %c0_i32 = arith.constant 0 : i32
    %c0_i32_0 = arith.constant 0 : i32
    %c0_i32_1 = arith.constant 0 : i32
    return %c0_i32, %c0_i32_0 : i32, i32
  }
  func.func @transform_2(%arg0: i32) -> (i32, i32) {
    %c0_i32 = arith.constant 0 : i32
    %c0_i32_0 = arith.constant 0 : i32
    %c0_i32_1 = arith.constant 0 : i32
    return %c0_i32, %c0_i32_0 : i32, i32
  }
  func.func @transform_3(%arg0: i32) -> (i32, i32) {
    %c0_i32 = arith.constant 0 : i32
    %c0_i32_0 = arith.constant 0 : i32
    %c0_i32_1 = arith.constant 0 : i32
    return %c0_i32, %c0_i32_0 : i32, i32
  }
  func.func @transform_4(%arg0: i32) -> (i32, i32) {
    %c0_i32 = arith.constant 0 : i32
    %c0_i32_0 = arith.constant 0 : i32
    %c0_i32_1 = arith.constant 0 : i32
    return %c0_i32, %c0_i32_0 : i32, i32
  }
  func.func @transform_5(%arg0: i32) -> (i32, i32) {
    %c0_i32 = arith.constant 0 : i32
    %c0_i32_0 = arith.constant 0 : i32
    return %arg0, %c0_i32 : i32, i32
  }
}

</mosaic_0001>

<bundles_post_ra>
// kernel: tpu_custom_call.1
= control target key start
LH: loop header
LB: loop body
LE: loop exit
PB: predicated region body
PF: predicated region fallthrough
CT: control target
= control target key end

     0   :  { %s220_s0 = inlined_call_operand.vmem [shape: f32[8,32], index: 0, kind: input, shape index: {}]   ;;  %s221_s1 = inlined_call_operand.vmem [shape: f32[32,64], index: 1, kind: input, shape index: {}]   ;;  %s222_s2 = inlined_call_operand.vmem [shape: f32[1,64], index: 2, kind: input, shape index: {}]   ;;  %s223_s3 = inlined_call_operand.vmem [shape: f32[64,32], index: 3, kind: input, shape index: {}]   ;;  %s224_s4 = inlined_call_operand.vmem [shape: f32[1,32], index: 4, kind: input, shape index: {}]   ;;  %s225_s5 = inlined_call_operand.hbm [shape: f32[8,32], index: 5, kind: output, shape index: {}]  }
   0x1   :  { %v25_v0 = vld [vmem:[%s221_s1 + $0x18] sm:$0xff]  ;;  %v24_v1 = vld [vmem:[%s221_s1 + $0x10] sm:$0xff]  ;;  %v23_v3 = vld [vmem:[%s221_s1 + $0x8] sm:$0xff] }
   0x2   :  { %46 = vmatpush.msra.mxu0 %v25_v0  ;;  %v62_v2 = vld [vmem:[%s223_s3 + $0x38] sm:$0xff]  ;;  %v61_v4 = vld [vmem:[%s223_s3 + $0x30] sm:$0xff]  ;;  %v60_v5 = vld [vmem:[%s223_s3 + $0x28] sm:$0xff] }
   0x3   :  { %79 = vmatpush.msra.mxu1 %v62_v2  ;;  %v22_v6 = vld [vmem:[%s221_s1] sm:$0xff] }
   0x4   :  { %47 = vmatpush.msra.mxu0 %v24_v1 }
   0x5   :  { %80 = vmatpush.msra.mxu1 %v61_v4 }
   0x6   :  { %10 = vsyncpa [#allocation3], 0  ;;  %48 = vmatpush.msra.mxu0 %v23_v3  ;;  %v21_v7 = vld [vmem:[%s220_s0] sm:$0xff]  ;;  %vm30_vm0 = vcmask 261120   ;;  %v58_v9 = vld [vmem:[%s223_s3 + $0x18] sm:$0xff]  ;;  %vm67_vm1 = vcmask 523264  }
   0x7   :  { %v59_v8 = vld [vmem:[%s223_s3 + $0x20] sm:$0xff]  ;;  %81 = vmatpush.msra.mxu1 %v60_v5  ;;  %v57_v10 = vld [vmem:[%s223_s3 + $0x10] sm:$0xff]  ;;  %v56_v11 = vld [vmem:[%s223_s3 + $0x8] sm:$0xff]  ;;  %s139_s21 = smov [#allocation2]  }
   0x8   :  { %49 = vmatpush.msra.mxu0 %v22_v6  ;;  %v55_v12 = vld [vmem:[%s223_s3] sm:$0xff]  ;;  %s97_s22 = sshll.u32 %s139_s21, 4  ;;  %s99_s3 = sshll.u32 %s225_s5, 4  ;;  %s98_s22 = int_to_ptr.vmem [resolvable:$true] %s97_s22  ;;  %s100_s3 = int_to_ptr.hbm [resolvable:$true] %s99_s3 }
   0x9   :  { %108 = vmatmul.msk.f32.vlgmr.msra.gmra.mxu0 %vm30_vm0, %v21_v7  ;;  %82 = vmatpush.msra.mxu1 %v59_v8  ;;  %v111_v13 = vld [vmem:[%s222_s2] ss:$0 sm:$0xff] }
   0xa   :  { %v112_v17 = vld [vmem:[%s224_s4] ss:$0 sm:$0xff] }
   0xb   :  { %83 = vmatpush.msra.mxu1 %v58_v9 }
   0xd   :  { %84 = vmatpush.msra.mxu1 %v57_v10 }
   0xf   :  { %85 = vmatpush.msra.mxu1 %v56_v11 }
  0x11   :  { %86 = vmatpush.msra.mxu1 %v55_v12 }
  0x86   :  { %v51_v14 = vpop.f32.mrf.mxu0 }
  0x87   :  { %v52_v15 = vadd.f32 %v111_v13, %v51_v14 }
  0x89   :  { %v54_v16 = vmax.f32 %v52_v15, 0.0 }
  0x8b   :  { %109 = vmatmul.msk.f32.vlgmr.msra.gmra.mxu1 %vm67_vm1, %v54_v16 }
 0x108   :  { %v88_v18 = vpop.f32.mrf.mxu1 }
 0x109   :  { %v89_v19 = vadd.f32 %v112_v17, %v88_v18 }
 0x10b   :  { %91 = vst.msk [vmem:[#allocation2] sm:$0xff] %vm30_vm0, %v89_v19 }
 0x10c   :  { %102 = dma.vmem_to_hbm [thread:$0]  %s98_s22, 128, %s100_s3, [#allocation3]  }
 0x10d   :  { %137 = dma.done.wait [#allocation3], 128  }
 0x10e   :  { %138 = vsyncadd [#allocation3], 4294967168 }
 0x10f   :  { %107 = vsyncpa [#allocation3], 1 }

</bundles_post_ra>
